<compile_context>
chip_gen: v7x
topology: tpu7x:2x2x1
jax: 0.10.0
libtpu: 0.0.40
codegen_flags: <defaults>
</compile_context>

<pallas_src>
import jax
import jax.numpy as jnp
from jax.experimental import pallas as pl
from jax.experimental.pallas import tpu as pltpu


def build_relative_embeddings(key, window_size=7):
    """Reproduce RelativeEmbeddings.__init__ deterministically in JAX."""
    ws = window_size
    n = 2 * ws - 1
    # B = torch.randn(2*ws - 1, 2*ws - 1)
    B = jax.random.normal(key, (n, n), dtype=jnp.float32)

    # PyTorch: x = arange(1, ws+1, 1/ws); x = (x[None,:] - x[:,None]).int()
    # i.e. x_idx[i, j] = trunc((j - i) / ws).  Built with exact integer
    # arithmetic (instead of a float arange) so accumulated float rounding can
    # never shift an index by 1.
    idx = jnp.arange(ws * ws, dtype=jnp.int32)
    diff = idx[None, :] - idx[:, None]                 # j - i
    x_idx = jnp.sign(diff) * (jnp.abs(diff) // ws)     # truncation toward zero

    # PyTorch: y = concat([arange(1, ws+1)] * ws); y = y[None,:] - y[:,None]
    ys = jnp.tile(jnp.arange(1, ws + 1, dtype=jnp.int32), ws)
    y_idx = ys[None, :] - ys[:, None]

    # Offsets lie in [-(ws-1), ws-1]; PyTorch wraps negative advanced indices
    # from the end, which for this range is exactly mod n.
    x_idx = jnp.mod(x_idx, n)
    y_idx = jnp.mod(y_idx, n)

    return B[x_idx, y_idx]  # (ws*ws, ws*ws)


def _add_bias_kernel(x_ref, emb_ref, o_ref):
    # x_ref: (t, N*N) lane-dense rows for t (batch, head) slices.
    # emb_ref: (1, N*N), resident across the whole grid (constant index_map);
    # the sublane broadcast in the add is a VPU splat, not a materialized temp.
    o_ref[...] = x_ref[...] + emb_ref[...]


def _round_up(v, m):
    return ((v + m - 1) // m) * m


def _pick_tile(bh, t_cap=512):
    """Rows per grid step.

    Returns t <= t_cap that is a multiple of 8 (legal sublane tiling) and, when
    bh >= 16, yields an even number of balanced grid steps so both of v7x's
    TensorCores get work (e.g. bh=300 -> 2 x 152, not 256 + 44).
    """
    if bh < 16:
        return bh  # single block; block dim == full array dim (always legal)
    n_pairs = pl.cdiv(bh, 2 * t_cap)           # >= 1
    n_steps = 2 * n_pairs                      # even number of steps
    return min(t_cap, _round_up(pl.cdiv(bh, n_steps), 8))


@jax.jit
def relative_embeddings_forward(x, embeddings):
    """x: (batch, heads, N, N); embeddings: (N, N). Returns x + embeddings."""
    b, h, n1, n2 = x.shape
    assert embeddings.shape == (n1, n2)
    bh = b * h
    row = n1 * n2

    # Lane-dense layout: one (batch, head) attention map per row of width N*N.
    x_flat = x.reshape(bh, row)
    emb_flat = embeddings.reshape(1, row).astype(x.dtype)

    t = _pick_tile(bh)
    grid = (pl.cdiv(bh, t),)

    itemsize = jnp.dtype(x.dtype).itemsize
    cost = pl.CostEstimate(
        flops=bh * row,
        transcendentals=0,
        bytes_accessed=(2 * bh * row + row) * itemsize,
    )

    out = pl.pallas_call(
        _add_bias_kernel,
        out_shape=jax.ShapeDtypeStruct((bh, row), x.dtype),
        grid_spec=pltpu.PrefetchScalarGridSpec(
            num_scalar_prefetch=0,
            grid=grid,
            in_specs=[
                pl.BlockSpec((t, row), lambda i: (i, 0)),
                pl.BlockSpec((1, row), lambda i: (0, 0)),  # bias stays resident
            ],
            out_specs=pl.BlockSpec((t, row), lambda i: (i, 0)),
        ),
        cost_estimate=cost,
        # NOTE: input_output_aliases={0: 0} would make this an in-place add,
        # but it only pays off when the caller donates x; with a live
        # (non-donated) x it forces XLA to insert an extra HBM copy, so it is
        # deliberately left off here.
        compiler_params=pltpu.CompilerParams(
            dimension_semantics=("parallel",),
            vmem_limit_bytes=48 * 1024 * 1024,
        ),
    )(x_flat, emb_flat)

    return out.reshape(b, h, n1, n2)


if __name__ == "__main__":
    window_size = 7
    N = window_size * window_size  # 49

    key = jax.random.PRNGKey(0)
    k_param, k_x1, k_x2 = jax.random.split(key, 3)

    embeddings = build_relative_embeddings(k_param, window_size)

    # Case 1: small shape from the module spec (single-block path, bh=8).
    x1 = jax.random.normal(k_x1, (2, 4, N, N), dtype=jnp.float32)
    out1 = jax.block_until_ready(relative_embeddings_forward(x1, embeddings))
    ref1 = x1 + embeddings[None, None, :, :]
    assert out1.shape == x1.shape
    assert jnp.allclose(out1, ref1, atol=1e-6, rtol=1e-6)

    # Case 2: bh=25 -> two balanced grid steps (16 + partial 9): exercises the
    # >=2-step megacore path and masked writes on the partial last block.
    x2 = jax.random.normal(k_x2, (5, 5, N, N), dtype=jnp.float32)
    out2 = jax.block_until_ready(relative_embeddings_forward(x2, embeddings))
    ref2 = x2 + embeddings[None, None, :, :]
    assert jnp.allclose(out2, ref2, atol=1e-6, rtol=1e-6)

    # Case 3: bf16 path (halves HBM traffic when the attention pipeline is bf16).
    x3 = x1.astype(jnp.bfloat16)
    out3 = jax.block_until_ready(relative_embeddings_forward(x3, embeddings))
    ref3 = x3 + embeddings.astype(jnp.bfloat16)[None, None, :, :]
    assert out3.dtype == jnp.bfloat16
    assert jnp.allclose(out3.astype(jnp.float32), ref3.astype(jnp.float32),
                        atol=1e-2, rtol=1e-2)

    print("KERNEL_OK")
</pallas_src>

<mosaic_0001>
module attributes {stable_mosaic.version = 11 : i64} {
  func.func @_add_bias_kernel(%arg0: i32, %arg1: memref<8x2401xf32, #tpu.memory_space<vmem>>, %arg2: memref<1x2401xf32, #tpu.memory_space<vmem>>, %arg3: memref<8x2401xf32, #tpu.memory_space<vmem>>) attributes {dimension_semantics = [#tpu.dimension_semantics<parallel>], iteration_bounds = array<i64: 1>, scalar_prefetch = 0 : i64, scratch_operands = 0 : i64, tpu.core_type = #tpu.core_type<tc>, window_params = [{transform_indices = @transform_0, window_bounds = array<i64: 8, 2401>}, {pipeline_mode = #tpu.pipeline_mode<synchronous>, transform_indices = @transform_1, window_bounds = array<i64: 1, 2401>}, {transform_indices = @transform_2, window_bounds = array<i64: 8, 2401>}]} {
    %c0 = arith.constant 0 : index
    %c0_0 = arith.constant 0 : index
    %0 = vector.load %arg1[%c0, %c0_0] : memref<8x2401xf32, #tpu.memory_space<vmem>>, vector<8x2401xf32>
    %c0_1 = arith.constant 0 : index
    %c0_2 = arith.constant 0 : index
    %1 = vector.load %arg2[%c0_1, %c0_2] : memref<1x2401xf32, #tpu.memory_space<vmem>>, vector<1x2401xf32>
    %2 = vector.broadcast %1 : vector<1x2401xf32> to vector<8x2401xf32>
    %3 = arith.addf %0, %2 : vector<8x2401xf32>
    %c0_3 = arith.constant 0 : index
    %c0_4 = arith.constant 0 : index
    %4 = vector.load %arg3[%c0_3, %c0_4] : memref<8x2401xf32, #tpu.memory_space<vmem>>, vector<8x2401xf32>
    tpu.vector_store %arg3[%c0_3, %c0_4], %3 {strides = array<i32>} : memref<8x2401xf32, #tpu.memory_space<vmem>>, vector<8x2401xf32>,
    return
  }
  func.func @transform_0(%arg0: i32) -> (i32, i32) {
    %c0_i32 = arith.constant 0 : i32
    %c0_i32_0 = arith.constant 0 : i32
    return %arg0, %c0_i32 : i32, i32
  }
  func.func @transform_1(%arg0: i32) -> (i32, i32) {
    %c0_i32 = arith.constant 0 : i32
    %c0_i32_0 = arith.constant 0 : i32
    %c0_i32_1 = arith.constant 0 : i32
    return %c0_i32, %c0_i32_0 : i32, i32
  }
  func.func @transform_2(%arg0: i32) -> (i32, i32) {
    %c0_i32 = arith.constant 0 : i32
    %c0_i32_0 = arith.constant 0 : i32
    return %arg0, %c0_i32 : i32, i32
  }
}

</mosaic_0001>

<bundles_post_ra>
// kernel: relative_embeddings_forward.1
= control target key start
LH: loop header
LB: loop body
LE: loop exit
PB: predicated region body
PF: predicated region fallthrough
CT: control target
= control target key end

     0   :  { %v36_v0 = vlaneseq  ;;  %vm168_vm0 = vcmask 793600   ;;  %s327_s0 = inlined_call_operand.vmem [shape: f32[8,2401], index: 0, kind: input, shape index: {}]   ;;  %s328_s1 = inlined_call_operand.vmem [shape: f32[1,2401], index: 1, kind: input, shape index: {}]   ;;  %s329_s2 = inlined_call_operand.vmem [shape: f32[8,2401], index: 2, kind: output, shape index: {}]  }
   0x1   :  { %v11_v2 = vld [vmem:[%s327_s0] sm:$0xff]  ;;  %v12_v5 = vld [vmem:[%s327_s0 + $0x8] sm:$0xff]  ;;  %v13_v7 = vld [vmem:[%s327_s0 + $0x10] sm:$0xff] }
   0x2   :  { %v37_v1 = vshrl.u32 %v36_v0, 7  ;;  %v30_v3 = vld [vmem:[%s328_s1] sm:$0xff]  ;;  %v14_v10 = vld [vmem:[%s327_s0 + $0x18] sm:$0xff]  ;;  %v16_v20 = vld [vmem:[%s327_s0 + $0x28] sm:$0xff] }
   0x3   :  { %v15_v11 = vld [vmem:[%s327_s0 + $0x20] sm:$0xff]  ;;  %v17_v21 = vld [vmem:[%s327_s0 + $0x30] sm:$0xff]  ;;  %v18_v22 = vld [vmem:[%s327_s0 + $0x38] sm:$0xff] }
   0x4   :  { %v195_v4 = vsub.s32 0, %v37_v1  ;;  %v200_v6 = vsub.s32 1, %v37_v1  ;;  %v205_v8 = vsub.s32 2, %v37_v1  ;;  %v50_v9 = vsub.s32 3, %v37_v1  ;;  %v31_v27 = vld [vmem:[%s328_s1 + $0x8] sm:$0xff]  ;;  %v19_v32 = vld [vmem:[%s327_s0 + $0x40] sm:$0xff] }
   0x5   :  { %v54_v12 = vsub.s32 4, %v37_v1  ;;  %v58_v13 = vsub.s32 5, %v37_v1  ;;  %v62_v14 = vsub.s32 6, %v37_v1  ;;  %v66_v15 = vsub.s32 7, %v37_v1  ;;  %v20_v33 = vld [vmem:[%s327_s0 + $0x48] sm:$0xff]  ;;  %v21_v38 = vld [vmem:[%s327_s0 + $0x50] sm:$0xff] }
   0x6   :  { %v39_v16 = vrot.slane %v30_v3, %v195_v4  ;;  %v43_v17 = vrot.slane %v30_v3, %v200_v6  ;;  %v47_v18 = vrot.slane %v30_v3, %v205_v8  ;;  %v51_v19 = vrot.slane %v30_v3, %v50_v9  ;;  %v22_v39 = vld [vmem:[%s327_s0 + $0x58] sm:$0xff]  ;;  %v23_v40 = vld [vmem:[%s327_s0 + $0x60] sm:$0xff]  ;;  %v24_v45 = vld [vmem:[%s327_s0 + $0x68] sm:$0xff] }
   0x7   :  { %v55_v23 = vrot.slane %v30_v3, %v54_v12  ;;  %v59_v24 = vrot.slane %v30_v3, %v58_v13  ;;  %v63_v25 = vrot.slane %v30_v3, %v62_v14  ;;  %v67_v26 = vrot.slane %v30_v3, %v66_v15  ;;  %v25_v46 = vld [vmem:[%s327_s0 + $0x70] sm:$0xff]  ;;  %v26_v47 = vld [vmem:[%s327_s0 + $0x78] sm:$0xff]  ;;  %v27_v61 = vld [vmem:[%s327_s0 + $0x80] sm:$0xff] }
   0x8   :  { %v131_v28 = vadd.f32 %v39_v16, %v11_v2  ;;  %v132_v29 = vadd.f32 %v43_v17, %v12_v5  ;;  %v133_v30 = vadd.f32 %v47_v18, %v13_v7  ;;  %v134_v31 = vadd.f32 %v51_v19, %v14_v10  ;;  %v32_v52 = vld [vmem:[%s328_s1 + $0x10] sm:$0x7]  ;;  %v28_v62 = vld [vmem:[%s327_s0 + $0x88] sm:$0xff] }
   0x9   :  { %v135_v34 = vadd.f32 %v55_v23, %v15_v11  ;;  %v136_v35 = vadd.f32 %v59_v24, %v16_v20  ;;  %v137_v36 = vadd.f32 %v63_v25, %v17_v21  ;;  %v138_v37 = vadd.f32 %v67_v26, %v18_v22  ;;  %v29_v63 = vld [vmem:[%s327_s0 + $0x90] sm:$0xff] }
   0xa   :  { %150 = vst [vmem:[%s329_s2] sm:$0xff] %v131_v28  ;;  %151 = vst [vmem:[%s329_s2 + $0x8] sm:$0xff] %v132_v29  ;;  %v71_v41 = vrot.slane %v31_v27, %v195_v4  ;;  %v75_v42 = vrot.slane %v31_v27, %v200_v6  ;;  %v79_v43 = vrot.slane %v31_v27, %v205_v8 }
   0xb   :  { %152 = vst [vmem:[%s329_s2 + $0x10] sm:$0xff] %v133_v30  ;;  %153 = vst [vmem:[%s329_s2 + $0x18] sm:$0xff] %v134_v31  ;;  %v83_v44 = vrot.slane %v31_v27, %v50_v9  ;;  %v87_v48 = vrot.slane %v31_v27, %v54_v12  ;;  %v91_v49 = vrot.slane %v31_v27, %v58_v13 }
   0xc   :  { %154 = vst [vmem:[%s329_s2 + $0x20] sm:$0xff] %v135_v34  ;;  %155 = vst [vmem:[%s329_s2 + $0x28] sm:$0xff] %v136_v35  ;;  %v95_v50 = vrot.slane %v31_v27, %v62_v14  ;;  %v99_v51 = vrot.slane %v31_v27, %v66_v15  ;;  %v139_v53 = vadd.f32 %v71_v41, %v19_v32 }
   0xd   :  { %156 = vst [vmem:[%s329_s2 + $0x30] sm:$0xff] %v137_v36  ;;  %157 = vst [vmem:[%s329_s2 + $0x38] sm:$0xff] %v138_v37  ;;  %v140_v54 = vadd.f32 %v75_v42, %v20_v33  ;;  %v141_v55 = vadd.f32 %v79_v43, %v21_v38  ;;  %v142_v56 = vadd.f32 %v83_v44, %v22_v39 }
   0xe   :  { %v143_v57 = vadd.f32 %v87_v48, %v23_v40  ;;  %v144_v58 = vadd.f32 %v91_v49, %v24_v45  ;;  %v145_v59 = vadd.f32 %v95_v50, %v25_v46  ;;  %v146_v60 = vadd.f32 %v99_v51, %v26_v47  ;;  %158 = vst [vmem:[%s329_s2 + $0x40] sm:$0xff] %v139_v53 }
   0xf   :  { %159 = vst [vmem:[%s329_s2 + $0x48] sm:$0xff] %v140_v54  ;;  %160 = vst [vmem:[%s329_s2 + $0x50] sm:$0xff] %v141_v55  ;;  %v103_v0 = vrot.slane %v32_v52, %v195_v4  ;;  %v107_v1 = vrot.slane %v32_v52, %v200_v6  ;;  %v111_v2 = vrot.slane %v32_v52, %v205_v8 }
  0x10   :  { %161 = vst [vmem:[%s329_s2 + $0x58] sm:$0xff] %v142_v56  ;;  %162 = vst [vmem:[%s329_s2 + $0x60] sm:$0xff] %v143_v57 }
  0x11   :  { %163 = vst [vmem:[%s329_s2 + $0x68] sm:$0xff] %v144_v58  ;;  %164 = vst [vmem:[%s329_s2 + $0x70] sm:$0xff] %v145_v59  ;;  %v147_v3 = vadd.f32 %v103_v0, %v27_v61  ;;  %v148_v4 = vadd.f32 %v107_v1, %v28_v62  ;;  %v149_v5 = vadd.f32 %v111_v2, %v29_v63 }
  0x12   :  { %165 = vst [vmem:[%s329_s2 + $0x78] sm:$0xff] %v146_v60 }
  0x13   :  { %166 = vst [vmem:[%s329_s2 + $0x80] sm:$0xff] %v147_v3  ;;  %167 = vst [vmem:[%s329_s2 + $0x88] sm:$0xff] %v148_v4 }
  0x14   :  { %169 = vst.msk [vmem:[%s329_s2 + $0x90] sm:$0xff] %vm168_vm0, %v149_v5 }

</bundles_post_ra>
